<compile_context>
chip_gen: v7x
topology: tpu7x:2x2x1
jax: 0.10.0
libtpu: 0.0.40
codegen_flags: <defaults>
</compile_context>

<pallas_src>
import jax
import jax.numpy as jnp
from jax.experimental import pallas as pl
from jax.experimental.pallas import tpu as pltpu


_MIN_PALLAS_BYTES = 1024 * 1024        # below this, XLA's fused transpose wins


def _fold_kernel(x_ref, o_ref):
    # x_ref: (TB, L, TD) block, o_ref: (TB, TD, L) block.
    # The entire compute of Fold is this batched minor-axis transpose (XLU).
    o_ref[...] = jnp.transpose(x_ref[...], (0, 2, 1))


def _sublane(itemsize):
    # Packed sublane count: f32 -> 8, bf16 -> 16, int8/fp8 -> 32.
    return max(8, 32 // itemsize)


def _padded_block_bytes(shape, itemsize):
    """VMEM footprint of a block after (sublane, lane) padding of the minor dims."""
    *lead, s, l = shape
    sub = _sublane(itemsize)
    s_pad = -(-s // sub) * sub
    l_pad = -(-l // 128) * 128
    n = 1
    for d in lead:
        n *= d
    return n * s_pad * l_pad * itemsize


def _step_bytes(tb, L, td, itemsize):
    """Padded VMEM bytes for ONE pipeline stage (input tile + output tile)."""
    return (_padded_block_bytes((tb, L, td), itemsize) +
            _padded_block_bytes((tb, td, L), itemsize))


def _tpu_constants():
    """Per-generation tiling constants (conservative fallback if query fails)."""
    phys_vmem = 64 * 1024 * 1024          # assume smallest (v7x per-TC) if unknown
    try:
        info = pltpu.get_tpu_info()
        phys_vmem = int(getattr(info, "vmem_capacity_bytes", phys_vmem))
    except Exception:
        pass
    if phys_vmem >= 128 * 1024 * 1024:    # v5e / v6e
        return dict(step_target=6 << 20, step_max=12 << 20,
                    vmem_floor=48 << 20, vmem_cap=100 << 20)
    # v7x (64 MiB per-TC physical, 32 MiB scoped default)
    return dict(step_target=4 << 20, step_max=6 << 20,
                vmem_floor=32 << 20, vmem_cap=56 << 20)


def _choose_feature_tile(L, D, itemsize, step_max):
    """Largest TD (a multiple of 128 dividing D, or D itself) with a bounded step."""
    if _step_bytes(1, L, D, itemsize) <= step_max or D % 128 != 0:
        # Either it fits, or D cannot be split legally (last block dim must be a
        # multiple of 128 or the full dim).  Oversized steps are handled by
        # raising vmem_limit_bytes from the true padded footprint in fold().
        return D
    cands = [t for t in range(128, D + 1, 128)
             if D % t == 0 and _step_bytes(1, L, t, itemsize) <= step_max]
    return max(cands) if cands else D


def _choose_batch_tile(B, L, TD, itemsize, n_td_steps, total_bytes, step_target):
    """How many batch elements to fold into one grid step."""
    per_b = _step_bytes(1, L, TD, itemsize)
    tb = min(B, max(1, step_target // per_b))
    # Pipeline depth: steady-state double-buffering needs several grid steps per
    # TensorCore to overlap read-DMA, XLU transpose and write-DMA (v7x: 2 TCs).
    if total_bytes >= (8 << 20):
        min_steps = 8
    elif total_bytes >= (2 << 20):
        min_steps = 4
    else:
        min_steps = 2
    min_batch_steps = max(1, -(-min_steps // n_td_steps))
    if B >= min_batch_steps:
        tb = min(tb, max(1, B // min_batch_steps))
    while B % tb:                          # tiles must cover B exactly
        tb -= 1
    return max(tb, 1)


def fold(x, n_locs, *, force_pallas=False, min_pallas_bytes=_MIN_PALLAS_BYTES):
    """Pallas implementation of Fold.forward.

    Args:
        x: array of shape (B*n_locs^2, C, H, W) or (B*n_locs^2, C).
        n_locs: number of locations per spatial side of the output.
        force_pallas: bypass the tiny-input fallback (for testing).
        min_pallas_bytes: below this total size, use XLA's transpose directly.

    Returns:
        array of shape (B, C*H*W, n_locs, n_locs), same dtype as x.
    """
    if x.ndim == 4:
        _, dim_c, dim_x, dim_y = x.shape
    elif x.ndim == 2:
        dim_c, dim_x, dim_y = x.shape[1], 1, 1
    else:
        raise ValueError(f"unsupported rank {x.ndim}")

    L = n_locs * n_locs
    D = dim_c * dim_x * dim_y
    if x.shape[0] % L != 0:
        raise ValueError("leading dim must be a multiple of n_locs^2")
    B = x.shape[0] // L

    # Glue: flatten (C, H, W) -> D and group locations per batch element.
    x_bld = x.reshape(B, L, D)

    itemsize = jnp.dtype(x.dtype).itemsize
    total_bytes = B * L * D * itemsize
    if not force_pallas and total_bytes < min_pallas_bytes:
        # Tiny-input fallback: fixed pallas_call/grid overhead dominates here.
        return jnp.swapaxes(x_bld, 1, 2).reshape(B, D, n_locs, n_locs)

    consts = _tpu_constants()
    TD = _choose_feature_tile(L, D, itemsize, consts["step_max"])
    n_td = D // TD
    TB = _choose_batch_tile(B, L, TD, itemsize, n_td, total_bytes,
                            consts["step_target"])

    # vmem_limit derived from the PADDED double-buffered footprint (+ margin).
    step_bytes = _step_bytes(TB, L, TD, itemsize)
    vmem_limit = int(min(consts["vmem_cap"],
                         max(consts["vmem_floor"], 2 * step_bytes + (4 << 20))))

    # Block legality: input block (TB, L, TD) -> last dim TD is a 128-multiple
    # or full-D, second-last is full-L; output block (TB, TD, L) -> second-last
    # TD is an 8-multiple or full-D, last is full-L.  Leading TB unconstrained.
    if n_td == 1:
        grid = (B // TB,)
        in_specs = [pl.BlockSpec((TB, L, TD), lambda g: (g, 0, 0))]
        out_specs = pl.BlockSpec((TB, TD, L), lambda g: (g, 0, 0))
        dim_sem = ("parallel",)
    else:
        grid = (B // TB, n_td)
        in_specs = [pl.BlockSpec((TB, L, TD), lambda g, k: (g, 0, k))]
        out_specs = pl.BlockSpec((TB, TD, L), lambda g, k: (g, k, 0))
        dim_sem = ("parallel", "parallel")

    out_bdl = pl.pallas_call(
        _fold_kernel,
        out_shape=jax.ShapeDtypeStruct((B, D, L), x.dtype),
        grid_spec=pltpu.PrefetchScalarGridSpec(
            num_scalar_prefetch=0,
            grid=grid,
            in_specs=in_specs,
            out_specs=out_specs,
        ),
        compiler_params=pltpu.CompilerParams(
            dimension_semantics=dim_sem,
            vmem_limit_bytes=vmem_limit,
        ),
        cost_estimate=pl.CostEstimate(
            flops=0,
            transcendentals=0,
            bytes_accessed=2 * B * L * D * itemsize,
        ),
    )(x_bld)

    # Glue: unflatten the location axis back to (n_locs, n_locs); contiguous.
    return out_bdl.reshape(B, D, n_locs, n_locs)


def fold_reference(x, n_locs):
    """Pure-JAX reference matching the PyTorch code exactly."""
    x_shape = x.shape[1:]
    if len(x_shape) == 3:
        dim_c, dim_x, dim_y = x_shape
    else:
        dim_c, dim_x, dim_y = x_shape[0], 1, 1
    L = n_locs * n_locs
    x = x.reshape(-1, L, dim_c, dim_x * dim_y)
    x = jnp.transpose(x, (0, 2, 3, 1)).reshape(
        -1, dim_c * dim_x * dim_y, n_locs, n_locs)
    return x


if __name__ == "__main__":
    key = jax.random.PRNGKey(0)
    k1, k2, k3 = jax.random.split(key, 3)
    ok = True

    # 1) Tiny "1x1" case from the module docs (B=2, C=4, n_locs=4 -> x: (32,4,1,1)):
    #    exercises both the fallback path and the forced Pallas path.
    n_locs = 4
    x1 = jax.random.normal(k1, (2 * n_locs * n_locs, 4, 1, 1), dtype=jnp.float32)
    ref1 = fold_reference(x1, n_locs)
    out1_auto = jax.block_until_ready(fold(x1, n_locs))                   # fallback
    out1_pl = jax.block_until_ready(fold(x1, n_locs, force_pallas=True))  # pallas
    ok &= out1_auto.shape == (2, 4, n_locs, n_locs)
    ok &= bool(jnp.array_equal(out1_auto, ref1))
    ok &= out1_pl.shape == (2, 4, n_locs, n_locs) and out1_pl.dtype == x1.dtype
    ok &= bool(jnp.array_equal(out1_pl, ref1))

    # 2) Moderate case exercising TB batching and the min-grid-step logic on the
    #    auto Pallas path: B=16, C=512, n_locs=8 -> x: (1024, 512, 1, 1) f32
    #    (2 MiB total), TD = D = 512 -> 1-D grid with >= 4 batch steps.
    n_locs2 = 8
    x2 = jax.random.normal(k2, (16 * n_locs2 * n_locs2, 512, 1, 1),
                           dtype=jnp.float32)
    out2 = jax.block_until_ready(fold(x2, n_locs2))
    ref2 = fold_reference(x2, n_locs2)
    ok &= out2.shape == (16, 512, n_locs2, n_locs2) and out2.dtype == x2.dtype
    ok &= bool(jnp.array_equal(out2, ref2))

    # 3) 2-D input branch, forced through the Pallas path: x: (32, 32) f32.
    x3 = jax.random.normal(k3, (2 * n_locs * n_locs, 32), dtype=jnp.float32)
    out3 = jax.block_until_ready(fold(x3, n_locs, force_pallas=True))
    ref3 = fold_reference(x3, n_locs)
    ok &= out3.shape == (2, 32, n_locs, n_locs) and out3.dtype == x3.dtype
    ok &= bool(jnp.array_equal(out3, ref3))

    if not ok:
        raise SystemExit("mismatch vs reference")
    print("KERNEL_OK")
</pallas_src>

<mosaic_0001>
module attributes {stable_mosaic.version = 11 : i64} {
  func.func @_fold_kernel(%arg0: i32, %arg1: memref<1x16x4xf32, #tpu.memory_space<vmem>>, %arg2: memref<1x4x16xf32, #tpu.memory_space<vmem>>) attributes {dimension_semantics = [#tpu.dimension_semantics<parallel>], iteration_bounds = array<i64: 2>, scalar_prefetch = 0 : i64, scratch_operands = 0 : i64, tpu.core_type = #tpu.core_type<tc>, window_params = [{transform_indices = @transform_0, window_bounds = array<i64: 1, 16, 4>}, {transform_indices = @transform_1, window_bounds = array<i64: 1, 4, 16>}]} {
    %c0 = arith.constant 0 : index
    %c0_0 = arith.constant 0 : index
    %c0_1 = arith.constant 0 : index
    %0 = vector.load %arg1[%c0, %c0_0, %c0_1] : memref<1x16x4xf32, #tpu.memory_space<vmem>>, vector<1x16x4xf32>
    %1 = tpu.transpose %0, [0, 2, 1] : vector<1x16x4xf32> -> vector<1x4x16xf32>
    %c0_2 = arith.constant 0 : index
    %c0_3 = arith.constant 0 : index
    %c0_4 = arith.constant 0 : index
    %2 = vector.load %arg2[%c0_2, %c0_3, %c0_4] : memref<1x4x16xf32, #tpu.memory_space<vmem>>, vector<1x4x16xf32>
    tpu.vector_store %arg2[%c0_2, %c0_3, %c0_4], %1 {strides = array<i32>} : memref<1x4x16xf32, #tpu.memory_space<vmem>>, vector<1x4x16xf32>,
    return
  }
  func.func @transform_0(%arg0: i32) -> (i32, i32, i32) {
    %c0_i32 = arith.constant 0 : i32
    %c0_i32_0 = arith.constant 0 : i32
    %c0_i32_1 = arith.constant 0 : i32
    return %arg0, %c0_i32, %c0_i32_0 : i32, i32, i32
  }
  func.func @transform_1(%arg0: i32) -> (i32, i32, i32) {
    %c0_i32 = arith.constant 0 : i32
    %c0_i32_0 = arith.constant 0 : i32
    %c0_i32_1 = arith.constant 0 : i32
    return %arg0, %c0_i32, %c0_i32_0 : i32, i32, i32
  }
}

</mosaic_0001>

<bundles_post_ra>
// kernel: tpu_custom_call.1
= control target key start
LH: loop header
LB: loop body
LE: loop exit
PB: predicated region body
PF: predicated region fallthrough
CT: control target
= control target key end

     0   :  { %6 = vsyncpa [#allocation3], 0  ;;  %s451_s0 = inlined_call_operand.vmem [shape: f32[2,16,4], index: 0, kind: input, shape index: {}]   ;;  %s452_s1 = inlined_call_operand.hbm [shape: f32[2,4,16], index: 1, kind: output, shape index: {}]  }
   0x1   :  { %8 = vsyncpa [#allocation3 + $0x1], 0  ;;  %s351_s6 = smov 0   ;;  %s353_s7 = smov 0  }
   0x2   :  { %s355_s8 = smov 0   ;;  %s357_s9 = smov 0  }
   0x3 LB: > { %s372_s10 = sadd.s32 4294967295, %s338_s9   ;;  %s224_s11 = sadd.s32 4294967294, %s338_s9   ;;  %s338_s9 = sphi %s357_s9, %s458_s9   ;;  %s334_s8 = sphi %s355_s8, %s457_s8   ;;  %s330_s7 = sphi %s353_s7, %s456_s7   ;;  %s326_s6 = sphi %s351_s6, %s455_s6  }
   0x4   : > { %s376_s12 = sadd.s32 1, %s338_s9   ;;  %s47_s13 = sadd.s32 1, %s334_s8 }
   0x5   : > { %s44_s14 = ssub.s32 %s338_s9, %s376_s12  ;;  %p57_p0 = scmp.ne.s32.totalorder %s334_s8, %s330_s7 }
   0x6   : > { %p45_p1 = scmp.eq.s32.totalorder %s44_s14, 0  ;;  %p58_p2 = scmp.eq.s32.totalorder %s372_s10, 1 }
   0x7   : > { %p63_p3 = scmp.ne.s32.totalorder %s330_s7, %s326_s6  ;;  %p64_p4 = scmp.eq.s32.totalorder %s224_s11, 1 }
   0x8   : > { %s387_s15 = scalar_select %p45_p1, %s334_s8, %s47_s13  }
   0x9   : > { %p389_p5 = por %p58_p2, %p57_p0  ;;  %p393_p6 = por %p64_p4, %p63_p3 }
   0xa   : > { %p227_p7 = scmp.ge.s32.totalorder %s338_s9, 1  ;;  %p90_p8 = scmp.lt.s32.totalorder %s338_s9, 3 }
   0xc   : > { %p91_p9 = pnand %p227_p7, %p90_p8 }
   0xd   : > { %p110_p10 = scmp.lt.s32.totalorder (!%p91_p9), %s372_s10, 1  ;;  %s107_s23 = sand.u32 (!%p91_p9), 1, %s330_s7   ;;  %vm149_vm0 = vcmask (!%p91_p9), 125952  }
   0xe   : > { %94 = sbr.rel (%p91_p9) target bundleno = 169 (0xa9), region = 24  ;;  %s228_s24 = sshll.u32 (!%p91_p9), %s107_s23, 2 }
   0xf   : > { %s232_s25 = sshll.u32 (!%p91_p9), %s372_s10, 6  ;;  %s109_s26 = scalar_lea.vmem (!%p91_p9), [#allocation2], %s228_s24 }
  0x10   : > { %s165_s27 = sshll.u32 (!%p91_p9), %s109_s26, 4  ;;  %s409_s30 = scalar_lea.hbm (!%p91_p9), %s452_s1, %s232_s25  ;;  %s411_s27 = int_to_ptr.vmem [resolvable:$true] %s165_s27 }
  0x11   : > { %s152_s2 = scalar_lea.sflag (!%p91_p9), [#allocation3], %s107_s23  ;;  %s276_s3 = scalar_lea.vmem (!%p91_p9), %s411_s27, 64 }
  0x12   : > { %p277_p11 = scmp.ne.s32.totalorder (!%p91_p9), %s411_s27, %s276_s3  ;;  %s340_s4 = smov (!%p91_p9), [#allocation2]  }
  0x13   : > { %s280_s5 = sshll.u32 (!%p91_p9), %s340_s4, 4  ;;  %s281_s5 = int_to_ptr.vmem [resolvable:$false] %s280_s5 }
  0x14   : > { %p278_p12 = pnand (!%p91_p9), %p277_p11, %p389_p5  ;;  %p283_p0 = scmp.lt.s32.totalorder (!%p91_p9), %s411_s27, %s281_s5 }
  0x15   : > { %s111_s18 = scalar_select %p110_p10, %s372_s10, 1 }
  0x16   : > { %p279_p13 = pneg %p278_p12  ;;  %s282_s10 = scalar_lea.vmem %s281_s5, 128 }
  0x17   : > { %s235_s19 = sshll.u32 %s111_s18, 4  ;;  %p284_p1 = scmp.lt.s32.totalorder %s282_s10, %s276_s3 }
  0x18   : > { %s114_s22 = scalar_lea.vmem %s451_s0, %s235_s19 }
  0x19   : > { %v115_v0 = vld [vmem:[%s114_s22] sm:$0xff]  ;;  %v116_v1 = vld [vmem:[%s114_s22 + $0x8] sm:$0xff]  ;;  %p285_p2 = por %p284_p1, %p283_p0 }
  0x1a   : > { %117 = vxpose.xlu0.b32.start [1/2] (short) (narrow) %v115_v0, 8 }
  0x1b   : > { %p286_p3 = pnand %p285_p2, %p279_p13 }
  0x1e   : > { %118 = vxpose.xlu0.b32.end [2/2] (short) (narrow) %v116_v1, 8 }
  0x9a   : > { %v133_v2 = vpop.trf.xlu0 }
  0x9b   : > { %150 = vst.msk [vmem:[%s109_s26] sm:$0xf] %vm149_vm0, %v133_v2 }
  0x9c   : > { %289 = shalt.err (!%p286_p3)
}
  0x9d   : > { %s290_s11 = scalar_lea.hbm %s409_s30, 64  ;;  %s294_s18 = scalar_lea.hbm %s452_s1, 128 }
  0x9e   : > { %p291_p4 = scmp.ne.s32.totalorder %s409_s30, %s290_s11  ;;  %p295_p9 = scmp.lt.u32.totalorder %s409_s30, %s452_s1 }
  0x9f   : > { %p296_p10 = scmp.lt.u32.totalorder %s294_s18, %s290_s11  ;;  %p298_p12 = scmp.lt.u32.totalorder %s290_s11, %s409_s30 }
  0xa0   : > { %p292_p7 = pnand %p291_p4, %p389_p5 }
  0xa1   : > { %p297_p11 = por %p296_p10, %p295_p9 }
  0xa2   : > { %p293_p8 = pneg %p292_p7 }
  0xa3   : > { %p299_p13 = por %p298_p12, %p297_p11 }
  0xa5   : > { %p300_p0 = pnand %p299_p13, %p293_p8 }
  0xa7   : > { %303 = shalt.err (!%p300_p0)
}
  0xa8   : > { %236 = dma.vmem_to_hbm [thread:$0]  (%p389_p5), %s411_s27, 64, %s409_s30, %s152_s2  }
  0xa9 PF: > { %p242_p1 = scmp.ge.s32.totalorder %s338_s9, 2  ;;  %s177_s21 = sand.u32 1, %s326_s6  }
  0xaa   : > { %s178_s22 = scalar_lea.sflag [#allocation3], %s177_s21 }
  0xab   : > { %p239_p2 = pnand %p242_p1, %p393_p6 }
  0xad   : > { %321 = dma.done.wait (!%p239_p2), %s178_s22, 64  }
  0xae   : > { %323 = vsyncadd (!%p239_p2), %s178_s22, 4294967232  ;;  %p11_p3 = scmp.ge.s32.totalorder %s376_s12, 4   ;;  %s455_s6 = smov %s330_s7 }
  0xaf   : > { %s456_s7 = smov %s334_s8  ;;  %s457_s8 = smov %s387_s15 }
  0xb0   : > { %s458_s9 = smov %s376_s12  ;;  %13 = sbr.rel (!%p11_p3) target bundleno = 3 (0x3), region = 59 }
  0xb7   :  { %183 = vsyncpa [#allocation3], 1 }
  0xb8   :  { %185 = vsyncpa [#allocation3 + $0x1], 1 }

</bundles_post_ra>
